<compile_context>
chip_gen: v7x
topology: tpu7x:2x2x1
jax: 0.10.0
libtpu: 0.0.40
codegen_flags: <defaults>
</compile_context>

<pallas_src>
import functools
import math

import jax
import jax.numpy as jnp
from jax.experimental import pallas as pl
from jax.experimental.pallas import tpu as pltpu

NUM_CLASSES = 10
Q = 0.8
DEFAULT_TILE_N = 16384          # batch columns (lanes) per grid step
_LOG_CLAMP = math.log(1e-4)     # torch.clamp(pred_y, 0.0001) in log space


def _gce_kernel(logits_ref, targets_ref, loss_ref, *, q):
    x = logits_ref[...].astype(jnp.float32)              # [C, T] classes x batch
    t = targets_ref[...]                                  # [1, T] int32 labels

    # Target-class logit per column (exactly one sublane matches per column);
    # replaces a materialized one-hot and a second masked reduce over exp().
    class_ids = jax.lax.broadcasted_iota(jnp.int32, x.shape, 0)     # [C, T]
    x_t = jnp.sum(jnp.where(class_ids == t, x, 0.0), axis=0, keepdims=True)

    # Numerically-stable log-sum-exp over the class (sublane) axis.
    m = jnp.max(x, axis=0, keepdims=True)                 # [1, T]
    lse = m + jnp.log(jnp.sum(jnp.exp(x - m), axis=0, keepdims=True))

    # log p of the target class, clamped at log(1e-4):
    #   clamp(p, 1e-4) ** q == exp(q * max(log p, log 1e-4))   (x**q monotone)
    z = jnp.maximum(x_t - lse, _LOG_CLAMP)                # [1, T]
    loss_ref[...] = ((1.0 - jnp.exp(q * z)) / q).astype(loss_ref.dtype)


def _round_up(x, m):
    return ((x + m - 1) // m) * m


def _choose_tile(n, tile_n):
    """Lane-aligned batch tile; keeps >=2 roughly equal grid steps when big."""
    if n <= 256:
        return n                        # single block covering the full axis
    half = _round_up(-(-n // 2), 128)   # ceil(n/2) rounded to a lane multiple
    t = min(tile_n, half)
    return max(128, (t // 128) * 128)


def gce_loss(outputs, targets, *, q=Q, xt="gd", tile_n=DEFAULT_TILE_N):
    """outputs: [N, NUM_CLASSES] float32 logits; targets: [N] integer labels."""
    n, c = outputs.shape
    assert c == NUM_CLASSES

    tile_n = _choose_tile(n, tile_n)
    grid = (pl.cdiv(n, tile_n),)

    # Lane-dense layouts: classes on sublanes, batch on lanes.
    # TODO(synk): fuse this transpose into the upstream producer if possible.
    logits_t = jnp.transpose(outputs, (1, 0))               # [C, N]
    targets_row = targets.astype(jnp.int32).reshape(1, n)   # [1, N]

    kernel = functools.partial(_gce_kernel, q=q)

    loss = pl.pallas_call(
        kernel,
        out_shape=jax.ShapeDtypeStruct((1, n), jnp.float32),
        grid_spec=pl.GridSpec(
            grid=grid,
            in_specs=[
                pl.BlockSpec((c, tile_n), lambda i: (0, i)),
                pl.BlockSpec((1, tile_n), lambda i: (0, i)),
            ],
            out_specs=pl.BlockSpec((1, tile_n), lambda i: (0, i)),
        ),
        compiler_params=pltpu.CompilerParams(
            # Samples (lanes) are independent -> parallel axis; shards across
            # v7x's two TensorCores when the grid has >= 2 steps.
            dimension_semantics=("parallel",),
            # ~1 MiB logits + <1 MiB targets/loss per double-buffered step at
            # the default tile; 48 MiB is safe on v5e/v6e (128 MiB) and v7x
            # (64 MiB) alike.
            vmem_limit_bytes=48 * 1024 * 1024,
        ),
    )(logits_t, targets_row)

    loss = loss.reshape(n)  # per-sample loss vector (xt='gd' path)
    if xt == "mean":
        # TODO(synk): accumulate per-tile partial sums in-kernel instead of a
        # second XLA reduction pass; default path is xt='gd' so it is cheap.
        return jnp.mean(loss)
    return loss


def gce_loss_ref(outputs, targets, *, q=Q, xt="gd"):
    """Pure-JAX reference implementation for verification."""
    onehot = jax.nn.one_hot(targets, NUM_CLASSES, dtype=jnp.float32)
    pred = jax.nn.softmax(outputs.astype(jnp.float32), axis=1)
    pred_y = jnp.sum(onehot * pred, axis=1)
    pred_y = jnp.maximum(pred_y, 0.0001)
    loss = (1.0 - jnp.power(pred_y, q)) / q
    if xt == "mean":
        return jnp.mean(loss)
    return loss


if __name__ == "__main__":
    key = jax.random.PRNGKey(0)
    k_logits, k_labels = jax.random.split(key)

    batch = 8
    outputs = jax.random.normal(k_logits, (batch, NUM_CLASSES), dtype=jnp.float32)
    targets = jax.random.randint(k_labels, (batch,), 0, NUM_CLASSES, dtype=jnp.int32)

    loss = gce_loss(outputs, targets)
    loss = jax.block_until_ready(loss)

    ref = gce_loss_ref(outputs, targets)
    assert loss.shape == (batch,)
    assert jnp.allclose(loss, ref, atol=1e-5, rtol=1e-5), (loss, ref)

    print("KERNEL_OK")
</pallas_src>

<mosaic_0001>
module attributes {stable_mosaic.version = 11 : i64} {
  func.func @_gce_kernel(%arg0: i32, %arg1: memref<10x8xf32, #tpu.memory_space<vmem>>, %arg2: memref<1x8xi32, #tpu.memory_space<vmem>>, %arg3: memref<1x8xf32, #tpu.memory_space<vmem>>) attributes {dimension_semantics = [#tpu.dimension_semantics<parallel>], iteration_bounds = array<i64: 1>, scalar_prefetch = 0 : i64, scratch_operands = 0 : i64, tpu.core_type = #tpu.core_type<tc>, window_params = [{transform_indices = @transform_0, window_bounds = array<i64: 10, 8>}, {transform_indices = @transform_1, window_bounds = array<i64: 1, 8>}, {transform_indices = @transform_2, window_bounds = array<i64: 1, 8>}]} {
    %c0 = arith.constant 0 : index
    %c0_0 = arith.constant 0 : index
    %0 = vector.load %arg1[%c0, %c0_0] : memref<10x8xf32, #tpu.memory_space<vmem>>, vector<10x8xf32>
    %c0_1 = arith.constant 0 : index
    %c0_2 = arith.constant 0 : index
    %1 = vector.load %arg2[%c0_1, %c0_2] : memref<1x8xi32, #tpu.memory_space<vmem>>, vector<1x8xi32>
    %2 = tpu.iota {dimensions = array<i32: 0>} : vector<10x8xi32>
    %3 = vector.broadcast %1 : vector<1x8xi32> to vector<10x8xi32>
    %4 = arith.cmpi eq, %2, %3 : vector<10x8xi32>
    %cst = arith.constant 0.000000e+00 : f32
    %5 = vector.broadcast %cst : f32 to vector<10x8xf32>
    %6 = arith.select %4, %0, %5 : vector<10x8xi1>, vector<10x8xf32>
    %cst_3 = arith.constant dense<0.000000e+00> : vector<8xf32>
    %7 = vector.multi_reduction <add>, %6, %cst_3 [0] : vector<10x8xf32> to vector<8xf32>
    %8 = vector.shape_cast %7 : vector<8xf32> to vector<1x8xf32>
    %cst_4 = arith.constant dense<0xFF800000> : vector<8xf32>
    %9 = vector.multi_reduction <maximumf>, %0, %cst_4 [0] : vector<10x8xf32> to vector<8xf32>
    %10 = vector.shape_cast %9 : vector<8xf32> to vector<1x8xf32>
    %11 = vector.broadcast %10 : vector<1x8xf32> to vector<10x8xf32>
    %12 = arith.subf %0, %11 : vector<10x8xf32>
    %13 = math.exp %12 : vector<10x8xf32>
    %cst_5 = arith.constant dense<0.000000e+00> : vector<8xf32>
    %14 = vector.multi_reduction <add>, %13, %cst_5 [0] : vector<10x8xf32> to vector<8xf32>
    %15 = vector.shape_cast %14 : vector<8xf32> to vector<1x8xf32>
    %16 = math.log %15 : vector<1x8xf32>
    %17 = arith.addf %10, %16 : vector<1x8xf32>
    %18 = arith.subf %8, %17 : vector<1x8xf32>
    %cst_6 = arith.constant -9.21034049 : f32
    %19 = vector.broadcast %cst_6 : f32 to vector<1x8xf32>
    %20 = arith.maximumf %18, %19 : vector<1x8xf32>
    %cst_7 = arith.constant 8.000000e-01 : f32
    %21 = vector.broadcast %cst_7 : f32 to vector<1x8xf32>
    %22 = arith.mulf %21, %20 : vector<1x8xf32>
    %23 = math.exp %22 : vector<1x8xf32>
    %cst_8 = arith.constant 1.000000e+00 : f32
    %24 = vector.broadcast %cst_8 : f32 to vector<1x8xf32>
    %25 = arith.subf %24, %23 : vector<1x8xf32>
    %cst_9 = arith.constant 8.000000e-01 : f32
    %26 = vector.broadcast %cst_9 : f32 to vector<1x8xf32>
    %27 = arith.divf %25, %26 : vector<1x8xf32>
    %c0_10 = arith.constant 0 : index
    %c0_11 = arith.constant 0 : index
    %28 = vector.load %arg3[%c0_10, %c0_11] : memref<1x8xf32, #tpu.memory_space<vmem>>, vector<1x8xf32>
    tpu.vector_store %arg3[%c0_10, %c0_11], %27 {strides = array<i32>} : memref<1x8xf32, #tpu.memory_space<vmem>>, vector<1x8xf32>,
    return
  }
  func.func @transform_0(%arg0: i32) -> (i32, i32) {
    %c0_i32 = arith.constant 0 : i32
    %c0_i32_0 = arith.constant 0 : i32
    return %c0_i32, %arg0 : i32, i32
  }
  func.func @transform_1(%arg0: i32) -> (i32, i32) {
    %c0_i32 = arith.constant 0 : i32
    %c0_i32_0 = arith.constant 0 : i32
    return %c0_i32, %arg0 : i32, i32
  }
  func.func @transform_2(%arg0: i32) -> (i32, i32) {
    %c0_i32 = arith.constant 0 : i32
    %c0_i32_0 = arith.constant 0 : i32
    return %c0_i32, %arg0 : i32, i32
  }
}

</mosaic_0001>

<bundles_post_ra>
// kernel: tpu_custom_call.1
= control target key start
LH: loop header
LB: loop body
LE: loop exit
PB: predicated region body
PF: predicated region fallthrough
CT: control target
= control target key end

     0   :  { %vm26_vm0 = vcmask 64512   ;;  %vm28_vm1 = vcmask 58368   ;;  %s165_s0 = inlined_call_operand.vmem [shape: f32[10,8], index: 0, kind: input, shape index: {}]   ;;  %s166_s1 = inlined_call_operand.vmem [shape: s32[1,8], index: 1, kind: input, shape index: {}]   ;;  %s167_s2 = inlined_call_operand.hbm [shape: f32[1,8], index: 2, kind: output, shape index: {}]  }
   0x1   :  { %v12_v0 = vld [vmem:[%s165_s0] sm:$0xff]  ;;  %v13_v1 = vld [vmem:[%s165_s0 + $0x8] sm:$0x3] }
   0x2   :  { %v37_v2 = vsel %vm26_vm0, %v12_v0, -inf }
   0x3   :  { %7 = vsyncpa [#allocation3], 0  ;;  %v38_v3 = vsel %vm28_vm1, %v13_v1, -inf  ;;  %v15_v10 = vlaneseq  ;;  %v88_v18 = vld [vmem:[%s166_s1] ss:$0 sm:$0xff]  ;;  %s122_s1 = smov [#allocation2]  }
   0x4   :  { %v39_v4 = vmax.f32 %v37_v2, %v38_v3  ;;  %s80_s14 = sshll.u32 %s122_s1, 4  ;;  %vm72_vm4 = vcmask 57344   ;;  %s81_s14 = int_to_ptr.vmem [resolvable:$true] %s80_s14 }
   0x5   :  { %v16_v14 = vshrl.u32 %v15_v10, 7  ;;  %s98_s15 = scalar_lea.vmem %s81_s14, 16  ;;  %s102_s16 = scalar_lea.vmem %s81_s14, 32 }
   0x6   :  { %v40_v5 = vrot.slane %v39_v4, 4  ;;  %p99_p0 = scmp.ne.s32.totalorder %s81_s14, %s98_s15  ;;  %p103_p1 = scmp.lt.s32.totalorder %s81_s14, %s81_s14 }
   0x7   :  { %v17_v17 = vadd.s32 8, %v16_v14  ;;  %vm22_vm2 = vcmp.eq.s32.totalorder %v16_v14, %v88_v18  ;;  %p104_p2 = scmp.lt.s32.totalorder %s102_s16, %s98_s15 }
   0x8   :  { %v41_v6 = vmax.f32 %v39_v4, %v40_v5  ;;  %v24_v19 = vsel %vm22_vm2, %v12_v0, 0.0 }
   0x9   :  { %vm23_vm3 = vcmp.eq.s32.totalorder %v17_v17, %v88_v18  ;;  %v27_v23 = vsel %vm26_vm0, %v24_v19, 0.0  ;;  %p105_p3 = por %p104_p2, %p103_p1 }
   0xa   :  { %v42_v7 = vrot.slane %v41_v6, 2  ;;  %v25_v20 = vsel %vm23_vm3, %v13_v1, 0.0 }
   0xb   :  { %v29_v24 = vsel %vm28_vm1, %v25_v20, 0.0  ;;  %p106_p4 = pnand %p105_p3, %p99_p0 }
   0xc   :  { %v43_v8 = vmax.f32 %v41_v6, %v42_v7  ;;  %v30_v28 = vadd.f32 %v29_v24, %v27_v23 }
   0xe   :  { %v44_v9 = vrot.slane %v43_v8, 1  ;;  %v31_v31 = vrot.slane %v30_v28, 4 }
  0x10   :  { %v45_v11 = vmax.f32 %v43_v8, %v44_v9  ;;  %v32_v34 = vadd.f32 %v31_v31, %v30_v28 }
  0x12   :  { %v46_v12 = vsub.f32 %v12_v0, %v45_v11  ;;  %v47_v13 = vsub.f32 %v13_v1, %v45_v11  ;;  %v33_v37 = vrot.slane %v32_v34, 2 }
  0x14   :  { %v48_v15 = vmul.f32 1.442695, %v46_v12  ;;  %v50_v16 = vmul.f32 1.442695, %v47_v13  ;;  %v34_v38 = vadd.f32 %v33_v37, %v32_v34 }
  0x16   :  { %90 = vpow2.f32 %v48_v15  ;;  %v35_v39 = vrot.slane %v34_v38, 1 }
  0x17   :  { %92 = vpow2.f32 %v50_v16 }
  0x18   :  { %v36_v41 = vadd.f32 %v35_v39, %v34_v38 }
  0x20   :  { %v91_v21 = vpop.eup %90 }
  0x21   :  { %v93_v22 = vpop.eup %92  ;;  %v52_v25 = vsel %vm26_vm0, %v91_v21, 0.0 }
  0x22   :  { %v53_v26 = vsel %vm28_vm1, %v93_v22, 0.0 }
  0x23   :  { %v54_v27 = vadd.f32 %v53_v26, %v52_v25 }
  0x25   :  { %v55_v29 = vrot.slane %v54_v27, 4 }
  0x27   :  { %v56_v30 = vadd.f32 %v55_v29, %v54_v27 }
  0x29   :  { %v57_v32 = vrot.slane %v56_v30, 2 }
  0x2b   :  { %v58_v33 = vadd.f32 %v57_v32, %v56_v30 }
  0x2d   :  { %v59_v35 = vrot.slane %v58_v33, 1 }
  0x2f   :  { %v60_v36 = vadd.f32 %v59_v35, %v58_v33 }
  0x31   :  { %94 = vlog2.f32 %v60_v36 }
  0x3b   :  { %v95_v40 = vpop.eup %94 }
  0x3c   :  { %v62_v42 = vmul.f32 0.6931472, %v95_v40 }
  0x3e   :  { %v63_v43 = vadd.f32 %v62_v42, %v45_v11 }
  0x40   :  { %v64_v44 = vsub.f32 %v36_v41, %v63_v43 }
  0x42   :  { %v65_v45 = vmax.f32 %v64_v44, -9.2103405 }
  0x44   :  { %v66_v46 = vmul.f32 0.8, %v65_v45 }
  0x46   :  { %v67_v47 = vmul.f32 1.442695, %v66_v46 }
  0x48   :  { %96 = vpow2.f32 %v67_v47 }
  0x52   :  { %v97_v48 = vpop.eup %96 }
  0x53   :  { %v69_v49 = vsub.f32 1.0, %v97_v48 }
  0x55   :  { %v71_v50 = vmul.f32 1.25, %v69_v49 }
  0x57   :  { %73 = vst.msk [vmem:[#allocation2] sm:$0x1] %vm72_vm4, %v71_v50 }
  0x58   :  { %109 = shalt.err (!%p106_p4)
}
  0x59   :  { %s110_s19 = scalar_lea.hbm %s167_s2, 16 }
  0x5a   :  { %p111_p5 = scmp.ne.s32.totalorder %s167_s2, %s110_s19  ;;  %p114_p6 = scmp.lt.u32.totalorder %s110_s19, %s167_s2 }
  0x5c   :  { %p116_p7 = pnand %p114_p6, %p111_p5 }
  0x5e   :  { %119 = shalt.err (!%p116_p7)
}
  0x5f   :  { %83 = dma.vmem_to_hbm [thread:$0]  %s81_s14, 16, %s167_s2, [#allocation3]  }
  0x60   :  { %120 = dma.done.wait [#allocation3], 16  }
  0x61   :  { %121 = vsyncadd [#allocation3], 4294967280 }
  0x62   :  { %87 = vsyncpa [#allocation3], 1 }

</bundles_post_ra>
